<compile_context>
chip_gen: v7x
topology: tpu7x:2x2x1
jax: 0.10.0
libtpu: 0.0.40
codegen_flags: <defaults>
</compile_context>

<pallas_src>
import functools

import jax
import jax.numpy as jnp
from jax.experimental import pallas as pl
from jax.experimental.pallas import tpu as pltpu


def _round_up(v, m):
    return ((v + m - 1) // m) * m


def _make_mlp_kernel(d_in, d_h0, d_h1, d_out):
    r1 = d_in
    r2 = d_in + d_h0
    r3 = d_in + d_h0 + d_h1

    def kernel(x_ref, wp_ref, bp_ref, o_ref):
        # x tile: (TB, d_in) in the input's native dtype; cast to bf16 here
        # (in-kernel) so the wrapper never streams a converted copy through HBM.
        x = x_ref[...].astype(jnp.bfloat16)

        # Packed weights: (d_in+d_h0+d_h1, W) bf16.  Packed biases: (3, W) f32.
        # Static slices pull out each layer; row offsets (0, 32, 96) are
        # sublane-aligned.
        w0 = wp_ref[0:r1, 0:d_h0]
        w1 = wp_ref[r1:r2, 0:d_h1]
        w2 = wp_ref[r2:r3, 0:d_out]
        b0 = bp_ref[0:1, 0:d_h0]
        b1 = bp_ref[1:2, 0:d_h1]
        b2 = bp_ref[2:3, 0:d_out]

        # Layer 0: bf16 MXU matmul, f32 accumulation; bias+ReLU in f32 on VPU.
        h = jnp.dot(x, w0, preferred_element_type=jnp.float32) + b0
        h = jnp.maximum(h, 0.0)
        # Layer 1: cast the f32 activation to bf16 only as the MXU operand.
        h = jnp.dot(h.astype(jnp.bfloat16), w1,
                    preferred_element_type=jnp.float32) + b1
        h = jnp.maximum(h, 0.0)
        # Layer 2: final linear (no activation).
        out = jnp.dot(h.astype(jnp.bfloat16), w2,
                      preferred_element_type=jnp.float32) + b2
        o_ref[...] = out.astype(o_ref.dtype)

    return kernel


def f2_forward(x, w0, b0, w1, b1, w2, b2, *, block_batch=8192):
    """Fused 3-layer MLP forward (relu, relu, linear) via one pallas_call."""
    batch, d_in = x.shape
    d_h0 = w0.shape[1]
    d_h1 = w1.shape[1]
    d_out = w2.shape[1]
    width = max(d_h0, d_h1, d_out)
    out_dtype = x.dtype

    def _pack_w(w):
        w = w.astype(jnp.bfloat16)
        return jnp.pad(w, ((0, 0), (0, width - w.shape[1])))

    def _pack_b(b):
        b = b.astype(jnp.float32).reshape(1, -1)
        return jnp.pad(b, ((0, 0), (0, width - b.shape[1])))

    # One contiguous weight slab + one contiguous bias slab; constant index_map
    # keeps them VMEM-resident (DMA'd once, not per grid step).
    w_pack = jnp.concatenate([_pack_w(w0), _pack_w(w1), _pack_w(w2)], axis=0)
    b_pack = jnp.concatenate([_pack_b(b0), _pack_b(b1), _pack_b(b2)], axis=0)

    # --- Batch tiling -------------------------------------------------------
    # Big tiles amortize per-step pipeline overhead, but cap the tile so large
    # batches split into >= 4 grid steps (so v7x's 2nd TensorCore gets work).
    block_batch = max(8, _round_up(block_batch, 8))
    tb = min(block_batch, max(8, _round_up(pl.cdiv(batch, 4), 8)))
    tb = min(tb, _round_up(batch, 8))          # never larger than padded batch
    n_blocks = pl.cdiv(batch, tb)
    padded = n_blocks * tb

    x_in = x
    if padded != batch:
        # Only taken when batch isn't a tile multiple; pads the *native-dtype*
        # x (no extra bf16 copy).  Padded rows are sliced off below.
        x_in = jnp.pad(x, ((0, padded - batch), (0, 0)))

    kernel = _make_mlp_kernel(d_in, d_h0, d_h1, d_out)

    out = pl.pallas_call(
        kernel,
        out_shape=jax.ShapeDtypeStruct((padded, d_out), out_dtype),
        grid=(n_blocks,),
        in_specs=[
            pl.BlockSpec((tb, d_in), lambda i: (i, 0)),        # x: batch-tiled
            pl.BlockSpec(w_pack.shape, lambda i: (0, 0)),      # weights resident
            pl.BlockSpec(b_pack.shape, lambda i: (0, 0)),      # biases resident
        ],
        out_specs=pl.BlockSpec((tb, d_out), lambda i: (i, 0)),
        compiler_params=pltpu.CompilerParams(
            dimension_semantics=("parallel",),                 # v7x: 2nd TC
            vmem_limit_bytes=32 * 1024 * 1024),                # v5e default is 16 MiB
    )(x_in, w_pack, b_pack)

    return out[:batch] if padded != batch else out


def _ref_forward_f32(x, w0, b0, w1, b1, w2, b2):
    t = jnp.maximum(x @ w0 + b0, 0.0)
    t = jnp.maximum(t @ w1 + b1, 0.0)
    return t @ w2 + b2


def _ref_forward_bf16(x, w0, b0, w1, b1, w2, b2):
    bf16 = jnp.bfloat16
    dot = functools.partial(jnp.dot, preferred_element_type=jnp.float32)
    t = dot(x.astype(bf16), w0.astype(bf16)) + b0
    t = jnp.maximum(t, 0.0)
    t = dot(t.astype(bf16), w1.astype(bf16)) + b1
    t = jnp.maximum(t, 0.0)
    return dot(t.astype(bf16), w2.astype(bf16)) + b2


if __name__ == "__main__":
    # Small shapes consistent with F2: x @ w0 @ w1 @ w2.
    batch, d_in, d_h0, d_h1, d_out = 8, 32, 64, 64, 16

    key = jax.random.PRNGKey(0)
    kx, k0, kb0, k1, kb1, k2, kb2 = jax.random.split(key, 7)

    x = jax.random.normal(kx, (batch, d_in), dtype=jnp.float32)
    w0 = jax.random.normal(k0, (d_in, d_h0), dtype=jnp.float32) * 0.1
    b0 = jax.random.normal(kb0, (d_h0,), dtype=jnp.float32) * 0.1
    w1 = jax.random.normal(k1, (d_h0, d_h1), dtype=jnp.float32) * 0.1
    b1 = jax.random.normal(kb1, (d_h1,), dtype=jnp.float32) * 0.1
    w2 = jax.random.normal(k2, (d_h1, d_out), dtype=jnp.float32) * 0.1
    b2 = jax.random.normal(kb2, (d_out,), dtype=jnp.float32) * 0.1

    out = f2_forward(x, w0, b0, w1, b1, w2, b2)
    out = jax.block_until_ready(out)
    assert out.shape == (batch, d_out)

    # Tight check vs. a reference that applies the same bf16 operand rounding
    # (f32 accumulation both sides).
    ref_bf = _ref_forward_bf16(x, w0, b0, w1, b1, w2, b2)
    assert jnp.allclose(out, ref_bf, atol=1e-3, rtol=1e-3), "mismatch vs bf16 reference"

    # Loose sanity check vs. the full-f32 PyTorch-equivalent reference
    # (matmul operands are rounded to bf16, so tolerance is widened).
    ref_f32 = _ref_forward_f32(x, w0, b0, w1, b1, w2, b2)
    assert jnp.allclose(out, ref_f32, atol=5e-2, rtol=5e-2), "mismatch vs f32 reference"

    print("KERNEL_OK")
</pallas_src>

<mosaic_0001>
module attributes {stable_mosaic.version = 11 : i64} {
  func.func @kernel(%arg0: i32, %arg1: memref<8x32xf32, #tpu.memory_space<vmem>>, %arg2: memref<160x64xbf16, #tpu.memory_space<vmem>>, %arg3: memref<3x64xf32, #tpu.memory_space<vmem>>, %arg4: memref<8x16xf32, #tpu.memory_space<vmem>>) attributes {dimension_semantics = [#tpu.dimension_semantics<parallel>], iteration_bounds = array<i64: 1>, scalar_prefetch = 0 : i64, scratch_operands = 0 : i64, tpu.core_type = #tpu.core_type<tc>, window_params = [{transform_indices = @transform_0, window_bounds = array<i64: 8, 32>}, {pipeline_mode = #tpu.pipeline_mode<synchronous>, transform_indices = @transform_1, window_bounds = array<i64: 160, 64>}, {pipeline_mode = #tpu.pipeline_mode<synchronous>, transform_indices = @transform_2, window_bounds = array<i64: 3, 64>}, {transform_indices = @transform_3, window_bounds = array<i64: 8, 16>}]} {
    %c0 = arith.constant 0 : index
    %c0_0 = arith.constant 0 : index
    %0 = vector.load %arg1[%c0, %c0_0] : memref<8x32xf32, #tpu.memory_space<vmem>>, vector<8x32xf32>
    %1 = arith.truncf %0 : vector<8x32xf32> to vector<8x32xbf16>
    %c0_1 = arith.constant 0 : index
    %c0_2 = arith.constant 0 : index
    %2 = vector.load %arg2[%c0_1, %c0_2] : memref<160x64xbf16, #tpu.memory_space<vmem>>, vector<32x64xbf16>
    %c32 = arith.constant 32 : index
    %c0_3 = arith.constant 0 : index
    %3 = vector.load %arg2[%c32, %c0_3] : memref<160x64xbf16, #tpu.memory_space<vmem>>, vector<64x64xbf16>
    %c96 = arith.constant 96 : index
    %c0_4 = arith.constant 0 : index
    %4 = vector.load %arg2[%c96, %c0_4] : memref<160x64xbf16, #tpu.memory_space<vmem>>, vector<64x16xbf16>
    %c0_5 = arith.constant 0 : index
    %c0_6 = arith.constant 0 : index
    %5 = vector.load %arg3[%c0_5, %c0_6] : memref<3x64xf32, #tpu.memory_space<vmem>>, vector<1x64xf32>
    %c1 = arith.constant 1 : index
    %c0_7 = arith.constant 0 : index
    %6 = vector.load %arg3[%c1, %c0_7] : memref<3x64xf32, #tpu.memory_space<vmem>>, vector<1x64xf32>
    %c2 = arith.constant 2 : index
    %c0_8 = arith.constant 0 : index
    %7 = vector.load %arg3[%c2, %c0_8] : memref<3x64xf32, #tpu.memory_space<vmem>>, vector<1x16xf32>
    %cst = arith.constant dense<0.000000e+00> : vector<8x64xf32>
    %8 = tpu.matmul %1, %2, %cst {dimension_numbers = #tpu.dot_dimension_numbers<[1], [0], [0], [1], [0, 0, 1, 1], [], []>} : vector<8x32xbf16>, vector<32x64xbf16>, vector<8x64xf32> -> vector<8x64xf32>
    %9 = vector.broadcast %5 : vector<1x64xf32> to vector<8x64xf32>
    %10 = arith.addf %8, %9 : vector<8x64xf32>
    %cst_9 = arith.constant 0.000000e+00 : f32
    %11 = vector.broadcast %cst_9 : f32 to vector<8x64xf32>
    %12 = arith.maximumf %10, %11 : vector<8x64xf32>
    %13 = arith.truncf %12 : vector<8x64xf32> to vector<8x64xbf16>
    %cst_10 = arith.constant dense<0.000000e+00> : vector<8x64xf32>
    %14 = tpu.matmul %13, %3, %cst_10 {dimension_numbers = #tpu.dot_dimension_numbers<[1], [0], [0], [1], [0, 0, 1, 1], [], []>} : vector<8x64xbf16>, vector<64x64xbf16>, vector<8x64xf32> -> vector<8x64xf32>
    %15 = vector.broadcast %6 : vector<1x64xf32> to vector<8x64xf32>
    %16 = arith.addf %14, %15 : vector<8x64xf32>
    %cst_11 = arith.constant 0.000000e+00 : f32
    %17 = vector.broadcast %cst_11 : f32 to vector<8x64xf32>
    %18 = arith.maximumf %16, %17 : vector<8x64xf32>
    %19 = arith.truncf %18 : vector<8x64xf32> to vector<8x64xbf16>
    %cst_12 = arith.constant dense<0.000000e+00> : vector<8x16xf32>
    %20 = tpu.matmul %19, %4, %cst_12 {dimension_numbers = #tpu.dot_dimension_numbers<[1], [0], [0], [1], [0, 0, 1, 1], [], []>} : vector<8x64xbf16>, vector<64x16xbf16>, vector<8x16xf32> -> vector<8x16xf32>
    %21 = vector.broadcast %7 : vector<1x16xf32> to vector<8x16xf32>
    %22 = arith.addf %20, %21 : vector<8x16xf32>
    %c0_13 = arith.constant 0 : index
    %c0_14 = arith.constant 0 : index
    %23 = vector.load %arg4[%c0_13, %c0_14] : memref<8x16xf32, #tpu.memory_space<vmem>>, vector<8x16xf32>
    tpu.vector_store %arg4[%c0_13, %c0_14], %22 {strides = array<i32>} : memref<8x16xf32, #tpu.memory_space<vmem>>, vector<8x16xf32>,
    return
  }
  func.func @transform_0(%arg0: i32) -> (i32, i32) {
    %c0_i32 = arith.constant 0 : i32
    %c0_i32_0 = arith.constant 0 : i32
    return %arg0, %c0_i32 : i32, i32
  }
  func.func @transform_1(%arg0: i32) -> (i32, i32) {
    %c0_i32 = arith.constant 0 : i32
    %c0_i32_0 = arith.constant 0 : i32
    %c0_i32_1 = arith.constant 0 : i32
    return %c0_i32, %c0_i32_0 : i32, i32
  }
  func.func @transform_2(%arg0: i32) -> (i32, i32) {
    %c0_i32 = arith.constant 0 : i32
    %c0_i32_0 = arith.constant 0 : i32
    %c0_i32_1 = arith.constant 0 : i32
    return %c0_i32, %c0_i32_0 : i32, i32
  }
  func.func @transform_3(%arg0: i32) -> (i32, i32) {
    %c0_i32 = arith.constant 0 : i32
    %c0_i32_0 = arith.constant 0 : i32
    return %arg0, %c0_i32 : i32, i32
  }
}

</mosaic_0001>

<bundles_post_ra>
// kernel: tpu_custom_call.1
= control target key start
LH: loop header
LB: loop body
LE: loop exit
PB: predicated region body
PF: predicated region fallthrough
CT: control target
= control target key end

     0   :  { %v362_v1 = vmov 0.0   ;;  %vm363_vm0 = vmmov 0   ;;  %vm57_vm1 = vcmask 261120   ;;  %s444_s0 = inlined_call_operand.vmem [shape: f32[8,32], index: 0, kind: input, shape index: {}]   ;;  %s445_s1 = inlined_call_operand.vmem [shape: bf16[160,64], index: 1, kind: input, shape index: {}]   ;;  %s446_s2 = inlined_call_operand.vmem [shape: f32[3,64], index: 2, kind: input, shape index: {}]   ;;  %s447_s3 = inlined_call_operand.hbm [shape: f32[8,16], index: 3, kind: output, shape index: {}]  }
   0x1   :  { %v328_v0 = vld [vmem:[%s445_s1] sm:$0xff]   ;;  %293 = vmatprep.subr.bf16.mxu0 %v362_v1  ;;  %v329_v2 = vld [vmem:[%s445_s1 + $0x8] sm:$0xff]   ;;  %301 = vmatprep.subr.bf16.mxu1 %v362_v1  ;;  %v330_v4 = vld [vmem:[%s445_s1 + $0x10] sm:$0xff]  }
   0x2   :  { %294 = vmatpush3.bf16.msra.mxu0 %v328_v0  ;;  %297 = vmatprep.mubr.msk.bf16.mxu0 %vm363_vm0, %v362_v1  ;;  %v16_v3 = vld [vmem:[%s444_s0] sm:$0xff]  ;;  %v331_v5 = vld [vmem:[%s445_s1 + $0x18] sm:$0xff]  }
   0x3   :  { %295 = vmatprep.subr.bf16.mxu0 %v362_v1  ;;  %309 = vmatprep.mubr.msk.bf16.mxu1 %vm363_vm0, %v362_v1  ;;  %v17_v6 = vpack.c.bf16 %v16_v3, %v16_v3 }
   0x4   :  { %302 = vmatpush3.bf16.msra.mxu1 %v330_v4 }
   0x5   :  { %303 = vmatprep.subr.bf16.mxu1 %v362_v1 }
   0x6   :  { %296 = vmatpush3.bf16.msra.mxu0 %v329_v2 }
   0x7   :  { %313 = vmatprep.subr.bf16.mxu0 %v362_v1 }
   0x8   :  { %8 = vsyncpa [#allocation3], 0  ;;  %304 = vmatpush3.bf16.msra.mxu1 %v331_v5  ;;  %v332_v7 = vld [vmem:[%s445_s1 + $0x20] sm:$0xff]   ;;  %v333_v8 = vld [vmem:[%s445_s1 + $0x28] sm:$0xff]   ;;  %vm131_vm2 = vcmask 523264   ;;  %s364_s12 = smov [#allocation2]  }
   0x9   :  { %298 = vmatmul.mubr.msk.bf16.vlgmr.msra.gmra.mrb[0].mxu0 %vm57_vm1, %v17_v6  ;;  %305 = vmatprep.subr.bf16.mxu1 %v362_v1  ;;  %v334_v9 = vld [vmem:[%s445_s1 + $0x30] sm:$0xff]   ;;  %v335_v10 = vld [vmem:[%s445_s1 + $0x38] sm:$0xff]   ;;  %v264_v11 = vld [vmem:[%s446_s2] ss:$0 sm:$0xff]  ;;  %vm248_vm3 = vcmask 130048  }
   0xa   :  { %321 = vmatprep.mubr.msk.bf16.mxu0 %vm363_vm0, %v362_v1  ;;  %314 = vmatpush3.bf16.msra.mxu0 %v334_v9  ;;  %v336_v19 = vld [vmem:[%s445_s1 + $0x40] sm:$0xff]   ;;  %v337_v20 = vld [vmem:[%s445_s1 + $0x48] sm:$0xff]   ;;  %s256_s1 = sshll.u32 %s364_s12, 4  ;;  %s257_s1 = int_to_ptr.vmem [resolvable:$true] %s256_s1 }
   0xb   :  { %315 = vmatprep.subr.bf16.mxu0 %v362_v1  ;;  %v268_v21 = vld [vmem:[%s446_s2 + $0x1] ss:$0 sm:$0xff]  ;;  %v274_v29 = vld [vmem:[%s446_s2 + $0x2] ss:$0 sm:$0xff]  ;;  %s338_s13 = scalar_lea.vmem %s257_s1, 128  ;;  %p343_p1 = scmp.lt.s32.totalorder %s257_s1, %s257_s1 }
   0xc   :  { %306 = vmatpush3.bf16.msra.mxu1 %v332_v7  ;;  %p339_p0 = scmp.ne.s32.totalorder %s257_s1, %s338_s13  ;;  %p344_p2 = scmp.lt.s32.totalorder %s338_s13, %s338_s13 }
   0xd   :  { %307 = vmatprep.subr.bf16.mxu1 %v362_v1 }
   0xe   :  { %316 = vmatpush3.bf16.msra.mxu0 %v335_v10  ;;  %p345_p3 = por %p344_p2, %p343_p1 }
   0xf   :  { %317 = vmatprep.subr.bf16.mxu0 %v362_v1 }
  0x10   :  { %308 = vmatpush3.bf16.msra.mxu1 %v333_v8  ;;  %p346_p4 = pnand %p345_p3, %p339_p0 }
  0x12   :  { %318 = vmatpush3.bf16.msra.mxu0 %v336_v19 }
  0x13   :  { %319 = vmatprep.subr.bf16.mxu0 %v362_v1 }
  0x16   :  { %320 = vmatpush3.bf16.msra.mxu0 %v337_v20 }
  0xdc   :  { %v95_v12 = vpop.f32.mrb[0].mxu0 }
  0xdd   :  { %v96_v13 = vadd.f32 %v264_v11, %v95_v12  ;;  %v299_v14 = vpop.f32.mrb[1].mxu0 }
  0xde   :  { %v98_v15 = vpop.f32.mrb[2].mxu0 }
  0xdf   :  { %v101_v16 = vmax.f32 %v96_v13, 0.0  ;;  %v300_v17 = vpop.f32.mrb[3].mxu0 }
  0xe1   :  { %v102_v18 = vpack.c.bf16 %v101_v16, %v101_v16 }
  0xe3   :  { %310 = vmatmul.mubr.msk.bf16.vlgmr.msra.gmra.mrb[0].mxu1 %vm131_vm2, %v102_v18 }
 0x1b6   :  { %v169_v22 = vpop.f32.mrb[0].mxu1 }
 0x1b7   :  { %v170_v23 = vadd.f32 %v268_v21, %v169_v22  ;;  %v311_v24 = vpop.f32.mrb[1].mxu1 }
 0x1b8   :  { %v172_v25 = vpop.f32.mrb[2].mxu1 }
 0x1b9   :  { %v175_v26 = vmax.f32 %v170_v23, 0.0  ;;  %v312_v27 = vpop.f32.mrb[3].mxu1 }
 0x1bb   :  { %v176_v28 = vpack.c.bf16 %v175_v26, %v175_v26 }
 0x1bd   :  { %322 = vmatmul.mubr.msk.bf16.vlgmr.msra.gmra.mrb[4].mxu0 %vm131_vm2, %v176_v28 }
 0x290   :  { %v242_v30 = vpop.f32.mrb[4].mxu0 }
 0x291   :  { %v243_v31 = vadd.f32 %v274_v29, %v242_v30  ;;  %v323_v32 = vpop.f32.mrb[5].mxu0 }
 0x292   :  { %v245_v33 = vpop.f32.mrb[6].mxu0 }
 0x293   :  { %v324_v34 = vpop.f32.mrb[7].mxu0  ;;  %249 = vst.msk [vmem:[#allocation2] sm:$0xff] %vm248_vm3, %v243_v31 }
 0x294   :  { %349 = shalt.err (!%p346_p4)
}
 0x295   :  { %s350_s2 = scalar_lea.hbm %s447_s3, 128 }
 0x296   :  { %p351_p5 = scmp.ne.s32.totalorder %s447_s3, %s350_s2  ;;  %p354_p6 = scmp.lt.u32.totalorder %s350_s2, %s447_s3 }
 0x298   :  { %p356_p7 = pnand %p354_p6, %p351_p5 }
 0x29a   :  { %359 = shalt.err (!%p356_p7)
}
 0x29b   :  { %259 = dma.vmem_to_hbm [thread:$0]  %s257_s1, 128, %s447_s3, [#allocation3]  }
 0x29c   :  { %360 = dma.done.wait [#allocation3], 128  }
 0x29d   :  { %361 = vsyncadd [#allocation3], 4294967168 }
 0x29e   :  { %263 = vsyncpa [#allocation3], 1 }

</bundles_post_ra>
